<compile_context>
chip_gen: v5e
topology: v5e:2x2
jax: 0.10.0
libtpu: 0.0.40
codegen_flags: <defaults>
</compile_context>

<pallas_src>
import functools

import jax
import jax.numpy as jnp
from jax.experimental import pallas as pl
from jax.experimental.pallas import tpu as pltpu


# ---------------------------------------------------------------------------
# Pallas kernel: all levels, one batch tile per grid step.
# ---------------------------------------------------------------------------
def _fused_attention_kernel(x_ref, w1t_ref, w2bd_ref, ctx_ref, *, bblk):
    # x_ref   : (Bblk, L, D)           batch tile
    # w1t_ref : (D, n_levels*D)        concat of first_linears[lvl].weight.T
    # w2bd_ref: (n_levels*D, C)        block-diag of second_linears[lvl].weight.T,
    #                                  C = n_levels * NL_max (zero padded)
    # ctx_ref : (Bblk, C, D)           per-level context vectors, levels stacked
    w1t = w1t_ref[...]
    w2bd = w2bd_ref[...]
    for b in range(bblk):  # static unroll; Bblk is small (<= 8)
        xb = x_ref[b]                                                 # [L, D]

        # h_lvl = tanh(x @ W1_lvl^T), all levels at once
        h = jnp.tanh(jnp.dot(xb, w1t,
                             preferred_element_type=jnp.float32))     # [L, nl*D]

        # scores: block-diagonal packing gives s[:, lvl-block] = h_lvl @ W2_lvl^T
        s = jnp.dot(h, w2bd,
                    preferred_element_type=jnp.float32)               # [L, C]

        # softmax over the sequence axis (per label column)
        s = s - jnp.max(s, axis=0, keepdims=True)
        e = jnp.exp(s)
        att = e / jnp.sum(e, axis=0, keepdims=True)                   # [L, C]

        # context_vector = att^T @ x  (all levels' labels at once)
        ctx = jnp.einsum("lc,ld->cd", att, xb,
                         preferred_element_type=jnp.float32)          # [C, D]
        ctx_ref[b] = ctx.astype(ctx_ref.dtype)


def run_fused_attention(x, w1t_stack, w2_blockdiag, *, bblk=None):
    """x:[B,L,D]  w1t_stack:[D, nl*D]  w2_blockdiag:[nl*D, C] -> ctx:[B, C, D]."""
    B, L, D = x.shape
    C = w2_blockdiag.shape[1]
    if bblk is None:
        bblk = B if B <= 8 else 8
    assert B % bblk == 0, (B, bblk)

    kernel = functools.partial(_fused_attention_kernel, bblk=bblk)
    grid_spec = pltpu.PrefetchScalarGridSpec(
        num_scalar_prefetch=0,
        grid=(B // bblk,),
        in_specs=[
            pl.BlockSpec((bblk, L, D), lambda i: (i, 0, 0)),            # x tile
            pl.BlockSpec(w1t_stack.shape, lambda i: (0, 0)),            # W1^T stack
            pl.BlockSpec(w2_blockdiag.shape, lambda i: (0, 0)),         # W2^T blkdiag
        ],
        out_specs=pl.BlockSpec((bblk, C, D), lambda i: (i, 0, 0)),
    )
    return pl.pallas_call(
        kernel,
        out_shape=jax.ShapeDtypeStruct((B, C, D), jnp.float32),
        grid_spec=grid_spec,
        compiler_params=pltpu.CompilerParams(
            dimension_semantics=("parallel",)),                         # v7x 2-TC
    )(x, w1t_stack, w2_blockdiag)


# ---------------------------------------------------------------------------
# Parameter construction (deterministic, mirrors the module's __init__ shapes)
# ---------------------------------------------------------------------------
def init_params(key, output_size, n_labels, n_levels, level_projection_size):
    params = []
    for lvl in range(n_levels):
        key, k1, k2, k3, k3b, kp = jax.random.split(key, 6)
        D = output_size
        NL = n_labels[lvl]
        ext = level_projection_size if lvl > 0 else 0
        p = {
            # AttentionLayer.first_linears[lvl]  : Linear(D, D, bias=False)
            "W1": 0.03 * jax.random.normal(k1, (D, D), jnp.float32),
            # AttentionLayer.second_linears[lvl] : Linear(D, NL, bias=False)
            "W2": 0.03 * jax.random.normal(k2, (NL, D), jnp.float32),
            # AttentionLayer.third_linears[lvl]  : Linear(D + ext, NL, bias=True)
            "W3": 0.03 * jax.random.normal(k3, (NL, D + ext), jnp.float32),
            "b3": jax.random.uniform(k3b, (NL,), jnp.float32,
                                     -1.0 / (D + ext) ** 0.5,
                                     1.0 / (D + ext) ** 0.5),
            # MISCAAttention.projection_linears[lvl] : Linear(NL, lps, bias=False)
            "Wp": jax.random.uniform(kp, (level_projection_size, NL),
                                     jnp.float32,
                                     -1.0 / NL ** 0.5, 1.0 / NL ** 0.5),
        }
        params.append(p)
    # NOTE: AttentionLayer.linear and MISCAAttention.linears exist in __init__
    # but are never used in forward(), so they are intentionally omitted.
    return params


def pack_attention_weights(params, output_size):
    """Pre-transpose/stack per-level weights once (done outside the forward)."""
    n_levels = len(params)
    D = output_size
    nls = [p["W2"].shape[0] for p in params]
    nl_max = max(nls)
    C = n_levels * nl_max
    w1t = jnp.concatenate([p["W1"].T for p in params], axis=1)       # [D, nl*D]
    w2bd = jnp.zeros((n_levels * D, C), jnp.float32)
    for lvl, p in enumerate(params):
        w2bd = w2bd.at[lvl * D:(lvl + 1) * D,
                       lvl * nl_max:lvl * nl_max + nls[lvl]].set(p["W2"].T)
    return {"W1T": w1t, "W2BD": w2bd, "NL_MAX": nl_max, "NLS": tuple(nls)}


# ---------------------------------------------------------------------------
# MISCAAttention.forward
# ---------------------------------------------------------------------------
def misca_forward(x, params, packed, n_levels):
    B, L, D = x.shape
    nl_max = packed["NL_MAX"]

    # One fused kernel call for every level's context vectors.
    ctx_all = run_fused_attention(x, packed["W1T"], packed["W2BD"])  # [B, C, D]

    prev = None
    context_vectors = []
    for lvl in range(n_levels):
        p = params[lvl]
        NL = p["W2"].shape[0]
        ctx = ctx_all[:, lvl * nl_max:lvl * nl_max + NL, :]          # [B, NL, D]

        if prev is not None:
            prev_rep = jnp.broadcast_to(prev[:, None, :],
                                        (B, NL, prev.shape[-1]))
            ctx = jnp.concatenate([ctx, prev_rep], axis=2)
        context_vectors.append(ctx)

        # weighted_output + inter-level projection (tiny, sequential -> plain JAX)
        wo = jnp.sum(p["W3"][None] * ctx, axis=2) + p["b3"][None]    # [B, NL]
        prev = jax.nn.sigmoid(jax.nn.sigmoid(wo) @ p["Wp"].T)
    return context_vectors


# ---------------------------------------------------------------------------
# Pure-JAX reference (mirrors the PyTorch forward) for verification.
# ---------------------------------------------------------------------------
def misca_forward_ref(x, params, n_levels):
    B = x.shape[0]
    prev = None
    context_vectors = []
    for lvl in range(n_levels):
        p = params[lvl]
        NL = p["W2"].shape[0]
        h = jnp.tanh(x @ p["W1"].T)
        att = jax.nn.softmax(h @ p["W2"].T, axis=1)                  # [B, L, NL]
        att = jnp.swapaxes(att, 1, 2)                                # [B, NL, L]
        ctx = att @ x                                                # [B, NL, D]
        if prev is not None:
            prev_rep = jnp.broadcast_to(prev[:, None, :],
                                        (B, NL, prev.shape[-1]))
            ctx = jnp.concatenate([ctx, prev_rep], axis=2)
        wo = jnp.sum(p["W3"][None] * ctx, axis=2) + p["b3"][None]
        context_vectors.append(ctx)
        prev = jax.nn.sigmoid(jax.nn.sigmoid(wo) @ p["Wp"].T)
    return context_vectors


if __name__ == "__main__":
    # Small shapes consistent with the module's forward.
    B, L, D = 2, 8, 32                 # batch, max_len, output_size
    n_levels = 2
    n_labels = [16, 12]
    level_projection_size = 8

    key = jax.random.PRNGKey(0)
    k_x, k_p = jax.random.split(key)
    x = jax.random.normal(k_x, (B, L, D), jnp.float32)
    params = init_params(k_p, D, n_labels, n_levels, level_projection_size)
    packed = pack_attention_weights(params, D)   # done once, outside forward

    ctx_vecs = misca_forward(x, params, packed, n_levels)
    ctx_vecs = [jax.block_until_ready(c) for c in ctx_vecs]

    ctx_ref = misca_forward_ref(x, params, n_levels)
    for got, ref in zip(ctx_vecs, ctx_ref):
        assert got.shape == ref.shape, (got.shape, ref.shape)
        assert jnp.allclose(got, ref, atol=1e-5, rtol=1e-5), (
            float(jnp.max(jnp.abs(got - ref))))

    print("KERNEL_OK")
</pallas_src>

<mosaic_0001>
module attributes {stable_mosaic.version = 11 : i64} {
  func.func @_fused_attention_kernel(%arg0: i32, %arg1: memref<2x8x32xf32, #tpu.memory_space<vmem>>, %arg2: memref<32x64xf32, #tpu.memory_space<vmem>>, %arg3: memref<64x32xf32, #tpu.memory_space<vmem>>, %arg4: memref<2x32x32xf32, #tpu.memory_space<vmem>>) attributes {dimension_semantics = [#tpu.dimension_semantics<parallel>], iteration_bounds = array<i64: 1>, scalar_prefetch = 0 : i64, scratch_operands = 0 : i64, tpu.core_type = #tpu.core_type<tc>, window_params = [{transform_indices = @transform_0, window_bounds = array<i64: 2, 8, 32>}, {pipeline_mode = #tpu.pipeline_mode<synchronous>, transform_indices = @transform_1, window_bounds = array<i64: 32, 64>}, {pipeline_mode = #tpu.pipeline_mode<synchronous>, transform_indices = @transform_2, window_bounds = array<i64: 64, 32>}, {transform_indices = @transform_3, window_bounds = array<i64: 2, 32, 32>}]} {
    %c0 = arith.constant 0 : index
    %c0_0 = arith.constant 0 : index
    %0 = vector.load %arg2[%c0, %c0_0] : memref<32x64xf32, #tpu.memory_space<vmem>>, vector<32x64xf32>
    %c0_1 = arith.constant 0 : index
    %c0_2 = arith.constant 0 : index
    %1 = vector.load %arg3[%c0_1, %c0_2] : memref<64x32xf32, #tpu.memory_space<vmem>>, vector<64x32xf32>
    %c0_3 = arith.constant 0 : index
    %c0_4 = arith.constant 0 : index
    %c0_5 = arith.constant 0 : index
    %2 = vector.load %arg1[%c0_3, %c0_4, %c0_5] : memref<2x8x32xf32, #tpu.memory_space<vmem>>, vector<1x8x32xf32>
    %3 = vector.shape_cast %2 : vector<1x8x32xf32> to vector<8x32xf32>
    %cst = arith.constant dense<0.000000e+00> : vector<8x64xf32>
    %4 = tpu.matmul %3, %0, %cst {dimension_numbers = #tpu.dot_dimension_numbers<[1], [0], [0], [1], [0, 0, 1, 1], [], []>} : vector<8x32xf32>, vector<32x64xf32>, vector<8x64xf32> -> vector<8x64xf32>
    %5 = math.tanh %4 : vector<8x64xf32>
    %cst_6 = arith.constant dense<0.000000e+00> : vector<8x32xf32>
    %6 = tpu.matmul %5, %1, %cst_6 {dimension_numbers = #tpu.dot_dimension_numbers<[1], [0], [0], [1], [0, 0, 1, 1], [], []>} : vector<8x64xf32>, vector<64x32xf32>, vector<8x32xf32> -> vector<8x32xf32>
    %cst_7 = arith.constant dense<0xFF800000> : vector<32xf32>
    %7 = vector.multi_reduction <maximumf>, %6, %cst_7 [0] : vector<8x32xf32> to vector<32xf32>
    %8 = vector.shape_cast %7 : vector<32xf32> to vector<1x32xf32>
    %9 = vector.broadcast %8 : vector<1x32xf32> to vector<8x32xf32>
    %10 = arith.subf %6, %9 : vector<8x32xf32>
    %11 = math.exp %10 : vector<8x32xf32>
    %cst_8 = arith.constant dense<0.000000e+00> : vector<32xf32>
    %12 = vector.multi_reduction <add>, %11, %cst_8 [0] : vector<8x32xf32> to vector<32xf32>
    %13 = vector.shape_cast %12 : vector<32xf32> to vector<1x32xf32>
    %14 = vector.broadcast %13 : vector<1x32xf32> to vector<8x32xf32>
    %15 = arith.divf %11, %14 : vector<8x32xf32>
    "tpu.trace_start"() <{level = 10 : i32, message = "lc,ld->cd"}> : () -> ()
    %cst_9 = arith.constant dense<0.000000e+00> : vector<32x32xf32>
    %16 = tpu.matmul %15, %3, %cst_9 {dimension_numbers = #tpu.dot_dimension_numbers<[0], [0], [1], [1], [0, 1, 1, 1], [], []>} : vector<8x32xf32>, vector<8x32xf32>, vector<32x32xf32> -> vector<32x32xf32>
    "tpu.trace_stop"() : () -> ()
    %c0_10 = arith.constant 0 : index
    %c0_11 = arith.constant 0 : index
    %c0_12 = arith.constant 0 : index
    %17 = vector.load %arg4[%c0_10, %c0_11, %c0_12] : memref<2x32x32xf32, #tpu.memory_space<vmem>>, vector<1x32x32xf32>
    %18 = vector.shape_cast %17 : vector<1x32x32xf32> to vector<32x32xf32>
    %19 = vector.shape_cast %16 : vector<32x32xf32> to vector<1x32x32xf32>
    tpu.vector_store %arg4[%c0_10, %c0_11, %c0_12], %19 {strides = array<i32>} : memref<2x32x32xf32, #tpu.memory_space<vmem>>, vector<1x32x32xf32>,
    %c1 = arith.constant 1 : index
    %c0_13 = arith.constant 0 : index
    %c0_14 = arith.constant 0 : index
    %20 = vector.load %arg1[%c1, %c0_13, %c0_14] : memref<2x8x32xf32, #tpu.memory_space<vmem>>, vector<1x8x32xf32>
    %21 = vector.shape_cast %20 : vector<1x8x32xf32> to vector<8x32xf32>
    %cst_15 = arith.constant dense<0.000000e+00> : vector<8x64xf32>
    %22 = tpu.matmul %21, %0, %cst_15 {dimension_numbers = #tpu.dot_dimension_numbers<[1], [0], [0], [1], [0, 0, 1, 1], [], []>} : vector<8x32xf32>, vector<32x64xf32>, vector<8x64xf32> -> vector<8x64xf32>
    %23 = math.tanh %22 : vector<8x64xf32>
    %cst_16 = arith.constant dense<0.000000e+00> : vector<8x32xf32>
    %24 = tpu.matmul %23, %1, %cst_16 {dimension_numbers = #tpu.dot_dimension_numbers<[1], [0], [0], [1], [0, 0, 1, 1], [], []>} : vector<8x64xf32>, vector<64x32xf32>, vector<8x32xf32> -> vector<8x32xf32>
    %cst_17 = arith.constant dense<0xFF800000> : vector<32xf32>
    %25 = vector.multi_reduction <maximumf>, %24, %cst_17 [0] : vector<8x32xf32> to vector<32xf32>
    %26 = vector.shape_cast %25 : vector<32xf32> to vector<1x32xf32>
    %27 = vector.broadcast %26 : vector<1x32xf32> to vector<8x32xf32>
    %28 = arith.subf %24, %27 : vector<8x32xf32>
    %29 = math.exp %28 : vector<8x32xf32>
    %cst_18 = arith.constant dense<0.000000e+00> : vector<32xf32>
    %30 = vector.multi_reduction <add>, %29, %cst_18 [0] : vector<8x32xf32> to vector<32xf32>
    %31 = vector.shape_cast %30 : vector<32xf32> to vector<1x32xf32>
    %32 = vector.broadcast %31 : vector<1x32xf32> to vector<8x32xf32>
    %33 = arith.divf %29, %32 : vector<8x32xf32>
    "tpu.trace_start"() <{level = 10 : i32, message = "lc,ld->cd"}> : () -> ()
    %cst_19 = arith.constant dense<0.000000e+00> : vector<32x32xf32>
    %34 = tpu.matmul %33, %21, %cst_19 {dimension_numbers = #tpu.dot_dimension_numbers<[0], [0], [1], [1], [0, 1, 1, 1], [], []>} : vector<8x32xf32>, vector<8x32xf32>, vector<32x32xf32> -> vector<32x32xf32>
    "tpu.trace_stop"() : () -> ()
    %c1_20 = arith.constant 1 : index
    %c0_21 = arith.constant 0 : index
    %c0_22 = arith.constant 0 : index
    %35 = vector.load %arg4[%c1_20, %c0_21, %c0_22] : memref<2x32x32xf32, #tpu.memory_space<vmem>>, vector<1x32x32xf32>
    %36 = vector.shape_cast %35 : vector<1x32x32xf32> to vector<32x32xf32>
    %37 = vector.shape_cast %34 : vector<32x32xf32> to vector<1x32x32xf32>
    tpu.vector_store %arg4[%c1_20, %c0_21, %c0_22], %37 {strides = array<i32>} : memref<2x32x32xf32, #tpu.memory_space<vmem>>, vector<1x32x32xf32>,
    return
  }
  func.func @transform_0(%arg0: i32) -> (i32, i32, i32) {
    %c0_i32 = arith.constant 0 : i32
    %c0_i32_0 = arith.constant 0 : i32
    %c0_i32_1 = arith.constant 0 : i32
    return %arg0, %c0_i32, %c0_i32_0 : i32, i32, i32
  }
  func.func @transform_1(%arg0: i32) -> (i32, i32) {
    %c0_i32 = arith.constant 0 : i32
    %c0_i32_0 = arith.constant 0 : i32
    %c0_i32_1 = arith.constant 0 : i32
    return %c0_i32, %c0_i32_0 : i32, i32
  }
  func.func @transform_2(%arg0: i32) -> (i32, i32) {
    %c0_i32 = arith.constant 0 : i32
    %c0_i32_0 = arith.constant 0 : i32
    %c0_i32_1 = arith.constant 0 : i32
    return %c0_i32, %c0_i32_0 : i32, i32
  }
  func.func @transform_3(%arg0: i32) -> (i32, i32, i32) {
    %c0_i32 = arith.constant 0 : i32
    %c0_i32_0 = arith.constant 0 : i32
    %c0_i32_1 = arith.constant 0 : i32
    return %arg0, %c0_i32, %c0_i32_0 : i32, i32, i32
  }
}

</mosaic_0001>

<bundles_post_ra>
// kernel: tpu_custom_call.1
= control target key start
LH: loop header
LB: loop body
LE: loop exit
PB: predicated region body
PF: predicated region fallthrough
CT: control target
= control target key end

     0   :  { %s511_s0 = inlined_call_operand.vmem [shape: f32[2,8,32], index: 0, kind: input, shape index: {}]   ;;  %s512_s1 = inlined_call_operand.vmem [shape: f32[32,64], index: 1, kind: input, shape index: {}]   ;;  %s513_s2 = inlined_call_operand.vmem [shape: f32[64,32], index: 2, kind: input, shape index: {}]   ;;  %s514_s3 = inlined_call_operand.hbm [shape: f32[2,32,32], index: 3, kind: output, shape index: {}]  }
   0x1   :  { %v18_v0 = vld [vmem:[%s512_s1 + $0x18] sm:$0xff]  ;;  %v17_v1 = vld [vmem:[%s512_s1 + $0x10] sm:$0xff]  ;;  %v27_v2 = vld [vmem:[%s511_s0] sm:$0xff] }
   0x2   :  { %44 = vmatpush.msra.mxu0 %v18_v0  ;;  %v26_v3 = vld [vmem:[%s513_s2 + $0x38] sm:$0xff]  ;;  %v16_v4 = vld [vmem:[%s512_s1 + $0x8] sm:$0xff]  ;;  %v25_v5 = vld [vmem:[%s513_s2 + $0x30] sm:$0xff]  ;;  %169 = vmatpush.msra.mxu2 %v27_v2 }
   0x3   :  { %65 = vmatpush.msra.mxu1 %v26_v3  ;;  %v24_v6 = vld [vmem:[%s513_s2 + $0x28] sm:$0xff] }
   0x4   :  { %45 = vmatpush.msra.mxu0 %v17_v1 }
   0x5   :  { %8 = vsyncpa [#allocation3], 0  ;;  %v15_v7 = vld [vmem:[%s512_s1] sm:$0xff]  ;;  %66 = vmatpush.msra.mxu1 %v25_v5  ;;  %vm28_vm0 = vcmask 261120   ;;  %v22_v9 = vld [vmem:[%s513_s2 + $0x18] sm:$0xff]  ;;  %vm53_vm1 = vcmask 523264  }
   0x6   :  { %46 = vmatpush.msra.mxu0 %v16_v4  ;;  %v23_v8 = vld [vmem:[%s513_s2 + $0x20] sm:$0xff]  ;;  %v21_v10 = vld [vmem:[%s513_s2 + $0x10] sm:$0xff]  ;;  %v20_v11 = vld [vmem:[%s513_s2 + $0x8] sm:$0xff]  ;;  %vm141_vm10 = vcmask 64512   ;;  %s352_s14 = sshll.u32 %s514_s3, 4  ;;  %s420_s15 = smov 128   ;;  %s353_s14 = int_to_ptr.hbm [resolvable:$true] %s352_s14 }
   0x7   :  { %67 = vmatpush.msra.mxu1 %v24_v6  ;;  %v19_v12 = vld [vmem:[%s513_s2] sm:$0xff]  ;;  %v370_v13 = vld [vmem:[%s511_s0 + $0x8] sm:$0xff]  ;;  %s419_s0 = smov [#allocation2]   ;;  %s421_s16 = smov 8  }
   0x8   :  { %47 = vmatpush.msra.mxu0 %v15_v7  ;;  %327 = vmatpush.msra.mxu3 %v370_v13  ;;  %s350_s2 = sshll.u32 %s419_s0, 4  ;;  %s351_s2 = int_to_ptr.vmem [resolvable:$true] %s350_s2 }
   0x9   :  { %364 = vmatmul.msk.f32.vlgmr.msra.gmra.mxu0 %vm28_vm0, %v27_v2  ;;  %68 = vmatpush.msra.mxu1 %v23_v8 }
   0xa   :  { %224 = vmatpush.msrb.mxu0 %v26_v3 }
   0xb   :  { %69 = vmatpush.msra.mxu1 %v22_v9 }
   0xc   :  { %225 = vmatpush.msrb.mxu0 %v25_v5 }
   0xd   :  { %70 = vmatpush.msra.mxu1 %v21_v10 }
   0xe   :  { %226 = vmatpush.msrb.mxu0 %v24_v6 }
   0xf   :  { %71 = vmatpush.msra.mxu1 %v20_v11 }
  0x10   :  { %227 = vmatpush.msrb.mxu0 %v23_v8 }
  0x11   :  { %72 = vmatpush.msra.mxu1 %v19_v12 }
  0x12   :  { %228 = vmatpush.msrb.mxu0 %v22_v9 }
  0x13   :  { %204 = vmatpush.msrb.mxu1 %v18_v0 }
  0x14   :  { %229 = vmatpush.msrb.mxu0 %v21_v10 }
  0x15   :  { %205 = vmatpush.msrb.mxu1 %v17_v1 }
  0x16   :  { %230 = vmatpush.msrb.mxu0 %v20_v11 }
  0x17   :  { %206 = vmatpush.msrb.mxu1 %v16_v4 }
  0x18   :  { %231 = vmatpush.msrb.mxu0 %v19_v12 }
  0x19   :  { %207 = vmatpush.msrb.mxu1 %v15_v7 }
  0x86   :  { %v49_v14 = vpop.f32.mrf.mxu0 }
  0x87   :  { %381 = vtanh.f32 %v49_v14 }
  0x8d   :  { %v382_v15 = vpop.eup %381 }
  0x8e   :  { %365 = vmatmul.msk.f32.vlgmr.msra.gmra.mxu1 %vm53_vm1, %v382_v15 }
  0x96   :  { %371 = vmatmul.msk.f32.vlgmr.msrb.gmra.mxu1 %vm28_vm0, %v370_v13 }
 0x10b   :  { %v74_v16 = vpop.f32.mrf.mxu1 }
 0x10c   :  { %v77_v17 = vsel %vm28_vm0, %v74_v16, -inf }
 0x10d   :  { %v78_v18 = vrot.slane %v77_v17, 4 }
 0x10f   :  { %v79_v19 = vmax.f32 %v77_v17, %v78_v18 }
 0x111   :  { %v80_v20 = vrot.slane %v79_v19, 2 }
 0x113   :  { %v81_v21 = vmax.f32 %v79_v19, %v80_v20  ;;  %v209_v22 = vpop.f32.mrf.mxu1 }
 0x114   :  { %383 = vtanh.f32 %v209_v22 }
 0x115   :  { %v82_v23 = vrot.slane %v81_v21, 1 }
 0x117   :  { %v83_v24 = vmax.f32 %v81_v21, %v82_v23 }
 0x119   :  { %v84_v25 = vsub.f32 %v74_v16, %v83_v24 }
 0x11a   :  { %v384_v26 = vpop.eup %383 }
 0x11b   :  { %v85_v27 = vmul.f32 1.442695, %v84_v25  ;;  %372 = vmatmul.msk.f32.vlgmr.msrb.gmra.mxu0 %vm53_vm1, %v384_v26 }
 0x11d   :  { %385 = vpow2.f32 %v85_v27 }
 0x123   :  { %v386_v28 = vpop.eup %385 }
 0x124   :  { %v87_v29 = vsel %vm28_vm0, %v386_v28, 0.0 }
 0x125   :  { %v88_v30 = vrot.slane %v87_v29, 4 }
 0x127   :  { %v89_v31 = vadd.f32 %v88_v30, %v87_v29 }
 0x129   :  { %v90_v32 = vrot.slane %v89_v31, 2 }
 0x12b   :  { %v91_v33 = vadd.f32 %v90_v32, %v89_v31 }
 0x12d   :  { %v92_v34 = vrot.slane %v91_v33, 1 }
 0x12f   :  { %v93_v35 = vadd.f32 %v92_v34, %v91_v33 }
 0x131   :  { %387 = vrcp.f32 %v93_v35  ;;  %v105_v39 = vand.u32 2147483648, %v93_v35  ;;  %v103_v41 = vand.u32 2147483647, %v93_v35  ;;  %vm99_vm3 = vweird.f32 %v93_v35 }
 0x133   :  { %v106_v43 = vor.u32 1.1754944e-38, %v105_v39  ;;  %vm104_vm5 = vcmp.eq.f32.partialorder %v103_v41, 8.507059e+37 }
 0x137   :  { %v388_v36 = vpop.eup %387 }
 0x138   :  { %v95_v37 = vmul.f32 %v388_v36, %v93_v35  ;;  %vm100_vm2 = vweird.f32 %v388_v36 }
 0x139   :  { %vm101_vm4 = vmor %vm99_vm3, %vm100_vm2 }
 0x13a   :  { %v96_v38 = vsub.f32 1.0, %v95_v37 }
 0x13c   :  { %v97_v40 = vmul.f32 %v388_v36, %v96_v38 }
 0x13e   :  { %v98_v42 = vadd.f32 %v388_v36, %v97_v40 }
 0x140   :  { %v102_v44 = vsel %vm101_vm4, %v388_v36, %v98_v42 }
 0x141   :  { %v107_v45 = vsel %vm104_vm5, %v106_v43, %v102_v44 }
 0x142   :  { %v108_v46 = vmul.f32 %v386_v28, %v107_v45 }
 0x144   :  { %109 = vxpose.xlu0.b32.start.end [1/1] (short) (narrow) %v108_v46, 32 }
 0x198   :  { %v233_v47 = vpop.f32.mrf.mxu0 }
 0x199   :  { %v236_v48 = vsel %vm28_vm0, %v233_v47, -inf }
 0x19a   :  { %v237_v49 = vrot.slane %v236_v48, 4 }
 0x19c   :  { %v238_v50 = vmax.f32 %v236_v48, %v237_v49 }
 0x19e   :  { %v239_v51 = vrot.slane %v238_v50, 2 }
 0x1a0   :  { %v240_v52 = vmax.f32 %v238_v50, %v239_v51 }
 0x1a2   :  { %v241_v53 = vrot.slane %v240_v52, 1 }
 0x1a4   :  { %v242_v54 = vmax.f32 %v240_v52, %v241_v53 }
 0x1a6   :  { %v243_v55 = vsub.f32 %v233_v47, %v242_v54 }
 0x1a8   :  { %v244_v56 = vmul.f32 1.442695, %v243_v55 }
 0x1aa   :  { %389 = vpow2.f32 %v244_v56 }
 0x1b0   :  { %v390_v57 = vpop.eup %389 }
 0x1b1   :  { %v246_v58 = vsel %vm28_vm0, %v390_v57, 0.0 }
 0x1b2   :  { %v247_v59 = vrot.slane %v246_v58, 4 }
 0x1b4   :  { %v248_v60 = vadd.f32 %v247_v59, %v246_v58 }
 0x1b6   :  { %v249_v61 = vrot.slane %v248_v60, 2 }
 0x1b8   :  { %v250_v62 = vadd.f32 %v249_v61, %v248_v60 }
 0x1ba   :  { %v251_v63 = vrot.slane %v250_v62, 1 }
 0x1bc   :  { %v252_v0 = vadd.f32 %v251_v63, %v250_v62 }
 0x1be   :  { %391 = vrcp.f32 %v252_v0  ;;  %v264_v4 = vand.u32 2147483648, %v252_v0  ;;  %v262_v6 = vand.u32 2147483647, %v252_v0  ;;  %vm258_vm7 = vweird.f32 %v252_v0 }
 0x1c0   :  { %v265_v8 = vor.u32 1.1754944e-38, %v264_v4  ;;  %vm263_vm9 = vcmp.eq.f32.partialorder %v262_v6, 8.507059e+37 }
 0x1c4   :  { %v392_v1 = vpop.eup %391 }
 0x1c5   :  { %v254_v2 = vmul.f32 %v392_v1, %v252_v0  ;;  %vm259_vm6 = vweird.f32 %v392_v1 }
 0x1c6   :  { %vm260_vm8 = vmor %vm258_vm7, %vm259_vm6 }
 0x1c7   :  { %v255_v3 = vsub.f32 1.0, %v254_v2 }
 0x1c9   :  { %v256_v5 = vmul.f32 %v392_v1, %v255_v3 }
 0x1cb   :  { %v257_v7 = vadd.f32 %v392_v1, %v256_v5 }
 0x1cd   :  { %v261_v9 = vsel %vm260_vm8, %v392_v1, %v257_v7 }
 0x1ce   :  { %v266_v10 = vsel %vm263_vm9, %v265_v8, %v261_v9 }
 0x1cf   :  { %v267_v11 = vmul.f32 %v390_v57, %v266_v10 }
 0x1d1   :  { %268 = vxpose.xlu0.b32.start.end [1/1] (short) (narrow) %v267_v11, 32 }
 0x1e8   :  { %v125_v12 = vpop.trf.xlu0 }
 0x1e9   :  { %366 = vmatmul.msk.f32.vlgmr.msra.gmra.mxu2 %vm141_vm10, %v125_v12 }
 0x1f0   :  { %v126_v13 = vpop.trf.xlu0 }
 0x1f1   :  { %367 = vmatmul.msk.f32.gmra.mxu2 %vm141_vm10, %v126_v13 }
 0x1f8   :  { %v127_v14 = vpop.trf.xlu0 }
 0x1f9   :  { %368 = vmatmul.msk.f32.gmra.mxu2 %vm141_vm10, %v127_v14 }
 0x200   :  { %v128_v15 = vpop.trf.xlu0 }
 0x201   :  { %369 = vmatmul.msk.f32.gmra.mxu2 %vm141_vm10, %v128_v15 }
 0x26c   :  { %v171_v16 = vpop.f32.mrf.mxu2 }
 0x26d   :  { %183 = vst.msk [vmem:[#allocation2] sm:$0xff] %vm28_vm0, %v171_v16 }
 0x274   :  { %v174_v18 = vpop.f32.mrf.mxu2 }
 0x275   :  { %v284_v17 = vpop.trf.xlu0  ;;  %184 = vst.msk [vmem:[#allocation2 + $0x8] sm:$0xff] %vm28_vm0, %v174_v18 }
 0x276   :  { %373 = vmatmul.msk.f32.vlgmr.msra.gmra.mxu3 %vm141_vm10, %v284_v17 }
 0x27c   :  { %v177_v20 = vpop.f32.mrf.mxu2 }
 0x27d   :  { %v285_v19 = vpop.trf.xlu0  ;;  %185 = vst.msk [vmem:[#allocation2 + $0x10] sm:$0xff] %vm28_vm0, %v177_v20 }
 0x27e   :  { %374 = vmatmul.msk.f32.gmra.mxu3 %vm141_vm10, %v285_v19 }
 0x284   :  { %v180_v22 = vpop.f32.mrf.mxu2 }
 0x285   :  { %v286_v21 = vpop.trf.xlu0  ;;  %186 = vst.msk [vmem:[#allocation2 + $0x18] sm:$0xff] %vm28_vm0, %v180_v22 }
 0x286   :  { %375 = vmatmul.msk.f32.gmra.mxu3 %vm141_vm10, %v286_v21 }
 0x28d   :  { %v287_v23 = vpop.trf.xlu0 }
 0x28e   :  { %376 = vmatmul.msk.f32.gmra.mxu3 %vm141_vm10, %v287_v23 }
 0x2f9   :  { %v329_v24 = vpop.f32.mrf.mxu3 }
 0x2fa   :  { %342 = vst.msk [vmem:[#allocation2 + $0x20] sm:$0xff] %vm28_vm0, %v329_v24 }
 0x301   :  { %v332_v25 = vpop.f32.mrf.mxu3 }
 0x302   :  { %343 = vst.msk [vmem:[#allocation2 + $0x28] sm:$0xff] %vm28_vm0, %v332_v25 }
 0x309   :  { %v335_v26 = vpop.f32.mrf.mxu3 }
 0x30a   :  { %344 = vst.msk [vmem:[#allocation2 + $0x30] sm:$0xff] %vm28_vm0, %v335_v26 }
 0x311   :  { %v338_v27 = vpop.f32.mrf.mxu3 }
 0x312   :  { %345 = vst.msk [vmem:[#allocation2 + $0x38] sm:$0xff] %vm28_vm0, %v338_v27 }
 0x313   :  { %358 = dma.vmem_to_hbm [thread:$0]  %s351_s2, 1024, %s353_s14, [#allocation3], %s420_s15, %s420_s15, %s421_s16  }
 0x314   :  { %417 = dma.done.wait [#allocation3], 1024  }
 0x315   :  { %418 = vsyncadd [#allocation3], 4294966272 }
 0x316   :  { %363 = vsyncpa [#allocation3], 1 }

</bundles_post_ra>
